<compile_context>
chip_gen: v7x
topology: tpu7x:2x2x1
jax: 0.10.0
libtpu: 0.0.40
codegen_flags: <defaults>
</compile_context>

<pallas_src>
import jax
import jax.numpy as jnp
from jax.experimental import pallas as pl
from jax.experimental.pallas import tpu as pltpu


def exchange_kernel(m1_ref, m2_ref, x0_ref, x1_ref, o1_ref, o2_ref):
    # m1_ref/m2_ref: (br, 1) or (1, bc) int32 masks, broadcast by jnp.where.
    # x*/o*:         (br, bc) data tiles in VMEM.
    m1 = m1_ref[...] != 0
    m2 = m2_ref[...] != 0
    x0 = x0_ref[...]
    x1 = x1_ref[...]
    o1_ref[...] = jnp.where(m1, x0, x1)
    o2_ref[...] = jnp.where(m2, x1, x0)


def _round_up(x, m):
    return ((x + m - 1) // m) * m


def _vmem_capacity_bytes():
    try:
        return int(pltpu.get_tpu_info().vmem_capacity_bytes)
    except Exception:
        return 64 << 20  # conservative fallback (v7x per-TC budget)


def _pick_block(rows, cols, itemsize, vmem_cap):
    """Generation-aware lane-dense (block_rows, block_cols, sublane_multiple)."""
    if vmem_cap >= (100 << 20):          # v5e / v6e: 128 MiB VMEM
        target_bytes, lane_cap = 4 << 20, 4096
    else:                                # v7x: 64 MiB VMEM
        target_bytes, lane_cap = 2 << 20, 2048

    # Lane axis: multiple of 128 (Pallas pads/masks any edge block).
    bc = min(lane_cap, _round_up(cols, 128))
    # Sublane axis: multiple of 8 (f32) / 16 (bf16) / 32 (int8), or full dim.
    sub = 8 * max(1, 4 // max(1, itemsize))
    max_r = max(1, target_bytes // (bc * itemsize))
    if max_r >= rows:
        br = rows
    else:
        br = max(sub, (max_r // sub) * sub)
        br = min(br, rows)
    return br, bc, sub


def _force_multi_block(rows, cols, br, bc, sub):
    """Ensure >= 2 grid blocks so both v7x TensorCores stream."""
    if pl.cdiv(rows, br) * pl.cdiv(cols, bc) >= 2:
        return br, bc
    # Prefer splitting the lane axis (stores stay lane-dense, 128-multiple).
    if bc >= 256:
        half = _round_up(bc // 2, 128)
        if half < bc and pl.cdiv(cols, half) >= 2:
            return br, half
    # Otherwise split the sublane axis (stay a multiple of `sub`).
    if br >= 2 * sub:
        half = max(sub, ((br // 2) // sub) * sub)
        if half < br and pl.cdiv(rows, half) >= 2:
            return half, bc
    return br, bc


def exchange(x0, x1, bn1_weight, bn2_weight, bn_threshold, donate_inputs=False):
    """x0, x1: (N, C, H, W). bn*_weight: (C,). Returns [out1, out2] in NCHW."""
    assert x0.shape == x1.shape and x0.dtype == x1.dtype
    N, C, H, W = x0.shape
    HW = H * W
    itemsize = jnp.dtype(x0.dtype).itemsize
    vmem_cap = _vmem_capacity_bytes()

    # Per-channel keep-masks, compared in the weights' native dtype so the
    # decision at the >= threshold boundary matches the reference exactly.
    m1c = (jnp.abs(bn1_weight) >= bn_threshold).astype(jnp.int32)
    m2c = (jnp.abs(bn2_weight) >= bn_threshold).astype(jnp.int32)

    if HW % 128 == 0:
        # Lane-dense (N*C, H*W) layout; per-row masks (row r = n*C + c).
        rows, cols = N * C, HW
        x0f = x0.reshape(rows, cols)
        x1f = x1.reshape(rows, cols)
        m1 = jnp.tile(m1c, N).reshape(rows, 1)
        m2 = jnp.tile(m2c, N).reshape(rows, 1)
        br, bc, sub = _pick_block(rows, cols, itemsize, vmem_cap)
        br, bc = _force_multi_block(rows, cols, br, bc, sub)
        mask_spec = pl.BlockSpec((br, 1), lambda i, j: (i, 0))
        mask_block_bytes = _round_up(br, 8) * 128 * 4   # (br,1) pads lanes to 128
    else:
        # H*W not lane-aligned (e.g. 7x7/14x14): flatten to (N, C*H*W) so the
        # output stores stay unmasked; masks expanded per lane position.
        # (Do NOT pad H*W up to 128 — that would add a full extra HBM pass.)
        rows, cols = N, C * HW
        x0f = x0.reshape(rows, cols)
        x1f = x1.reshape(rows, cols)
        m1 = jnp.repeat(m1c, HW).reshape(1, cols)
        m2 = jnp.repeat(m2c, HW).reshape(1, cols)
        br, bc, sub = _pick_block(rows, cols, itemsize, vmem_cap)
        br, bc = _force_multi_block(rows, cols, br, bc, sub)
        mask_spec = pl.BlockSpec((1, bc), lambda i, j: (0, j))
        mask_block_bytes = 8 * bc * 4                   # (1,bc) pads sublanes to 8

    grid = (pl.cdiv(rows, br), pl.cdiv(cols, bc))
    data_spec = pl.BlockSpec((br, bc), lambda i, j: (i, j))

    # VMEM budget from the actual footprint:
    #   4 data streams x 2 pipeline buffers x tile + 2 masks x 2 buffers + margin.
    tile_bytes = br * bc * itemsize
    footprint = 4 * 2 * tile_bytes + 2 * 2 * mask_block_bytes
    vmem_limit = max(16 << 20, footprint + (4 << 20))
    vmem_limit = min(vmem_limit, (vmem_cap * 3) // 4)

    data_bytes = rows * cols * itemsize
    mask_bytes = int(m1.size + m2.size) * 4
    cost = pl.CostEstimate(
        flops=0,
        transcendentals=0,
        bytes_accessed=4 * data_bytes + mask_bytes,
    )

    out_shape = (
        jax.ShapeDtypeStruct((rows, cols), x0.dtype),
        jax.ShapeDtypeStruct((rows, cols), x0.dtype),
    )

    # Inputs are (m1, m2, x0f, x1f); alias x0f->out1, x1f->out2 when donated.
    io_aliases = {2: 0, 3: 1} if donate_inputs else {}

    o1f, o2f = pl.pallas_call(
        exchange_kernel,
        out_shape=out_shape,
        grid=grid,
        in_specs=[mask_spec, mask_spec, data_spec, data_spec],
        out_specs=(data_spec, data_spec),
        input_output_aliases=io_aliases,
        cost_estimate=cost,
        compiler_params=pltpu.CompilerParams(
            dimension_semantics=("parallel", "parallel"),
            vmem_limit_bytes=int(vmem_limit),
        ),
    )(m1, m2, x0f, x1f)

    return [o1f.reshape(N, C, H, W), o2f.reshape(N, C, H, W)]


def exchange_ref(x0, x1, bn1_weight, bn2_weight, bn_threshold):
    """Pure-JAX reference mirroring the PyTorch forward."""
    m1 = (jnp.abs(bn1_weight) >= bn_threshold)[None, :, None, None]
    m2 = (jnp.abs(bn2_weight) >= bn_threshold)[None, :, None, None]
    return [jnp.where(m1, x0, x1), jnp.where(m2, x1, x0)]


def _run_case(key, N, C, H, W, bn_threshold=0.5):
    k0, k1, k2, k3 = jax.random.split(key, 4)
    x0 = jax.random.normal(k0, (N, C, H, W), dtype=jnp.float32)
    x1 = jax.random.normal(k1, (N, C, H, W), dtype=jnp.float32)
    bn1_w = jax.random.uniform(k2, (C,), dtype=jnp.float32, minval=-1.0, maxval=1.0)
    bn2_w = jax.random.uniform(k3, (C,), dtype=jnp.float32, minval=-1.0, maxval=1.0)

    out1, out2 = exchange(x0, x1, bn1_w, bn2_w, bn_threshold)
    jax.block_until_ready(out1)
    jax.block_until_ready(out2)

    ref1, ref2 = exchange_ref(x0, x1, bn1_w, bn2_w, bn_threshold)
    assert jnp.array_equal(out1, ref1), f"out1 mismatch ({N},{C},{H},{W})"
    assert jnp.array_equal(out2, ref2), f"out2 mismatch ({N},{C},{H},{W})"


if __name__ == "__main__":
    key = jax.random.PRNGKey(0)
    k_a, k_b = jax.random.split(key, 2)

    # Lane-aligned spatial (H*W % 128 == 0) -> (N*C, H*W) layout path.
    _run_case(k_a, N=2, C=4, H=16, W=16)
    # Non-aligned spatial (7x7 feature map) -> (N, C*H*W) fallback path.
    _run_case(k_b, N=2, C=4, H=7, W=7)

    print("KERNEL_OK")
</pallas_src>

<mosaic_0001>
module attributes {stable_mosaic.version = 11 : i64} {
  func.func @exchange_kernel(%arg0: i32, %arg1: i32, %arg2: memref<8x1xi32, #tpu.memory_space<vmem>>, %arg3: memref<8x1xi32, #tpu.memory_space<vmem>>, %arg4: memref<8x128xf32, #tpu.memory_space<vmem>>, %arg5: memref<8x128xf32, #tpu.memory_space<vmem>>, %arg6: memref<8x128xf32, #tpu.memory_space<vmem>>, %arg7: memref<8x128xf32, #tpu.memory_space<vmem>>) attributes {dimension_semantics = [#tpu.dimension_semantics<parallel>, #tpu.dimension_semantics<parallel>], iteration_bounds = array<i64: 1, 2>, scalar_prefetch = 0 : i64, scratch_operands = 0 : i64, tpu.core_type = #tpu.core_type<tc>, window_params = [{transform_indices = @transform_0, window_bounds = array<i64: 8, 1>}, {transform_indices = @transform_1, window_bounds = array<i64: 8, 1>}, {transform_indices = @transform_2, window_bounds = array<i64: 8, 128>}, {transform_indices = @transform_3, window_bounds = array<i64: 8, 128>}, {transform_indices = @transform_4, window_bounds = array<i64: 8, 128>}, {transform_indices = @transform_5, window_bounds = array<i64: 8, 128>}]} {
    %c0 = arith.constant 0 : index
    %c0_0 = arith.constant 0 : index
    %0 = vector.load %arg2[%c0, %c0_0] : memref<8x1xi32, #tpu.memory_space<vmem>>, vector<8x1xi32>
    %c0_i32 = arith.constant 0 : i32
    %1 = vector.broadcast %c0_i32 : i32 to vector<8x1xi32>
    %2 = arith.cmpi ne, %0, %1 : vector<8x1xi32>
    %c0_1 = arith.constant 0 : index
    %c0_2 = arith.constant 0 : index
    %3 = vector.load %arg3[%c0_1, %c0_2] : memref<8x1xi32, #tpu.memory_space<vmem>>, vector<8x1xi32>
    %c0_i32_3 = arith.constant 0 : i32
    %4 = vector.broadcast %c0_i32_3 : i32 to vector<8x1xi32>
    %5 = arith.cmpi ne, %3, %4 : vector<8x1xi32>
    %c0_4 = arith.constant 0 : index
    %c0_5 = arith.constant 0 : index
    %6 = vector.load %arg4[%c0_4, %c0_5] : memref<8x128xf32, #tpu.memory_space<vmem>>, vector<8x128xf32>
    %c0_6 = arith.constant 0 : index
    %c0_7 = arith.constant 0 : index
    %7 = vector.load %arg5[%c0_6, %c0_7] : memref<8x128xf32, #tpu.memory_space<vmem>>, vector<8x128xf32>
    %8 = vector.shape_cast %2 : vector<8x1xi1> to vector<8x1xi1>
    %9 = vector.broadcast %8 : vector<8x1xi1> to vector<8x128xi1>
    %10 = arith.select %9, %6, %7 : vector<8x128xi1>, vector<8x128xf32>
    %c0_8 = arith.constant 0 : index
    %c0_9 = arith.constant 0 : index
    %11 = vector.load %arg6[%c0_8, %c0_9] : memref<8x128xf32, #tpu.memory_space<vmem>>, vector<8x128xf32>
    tpu.vector_store %arg6[%c0_8, %c0_9], %10 {strides = array<i32>} : memref<8x128xf32, #tpu.memory_space<vmem>>, vector<8x128xf32>,
    %12 = vector.shape_cast %5 : vector<8x1xi1> to vector<8x1xi1>
    %13 = vector.broadcast %12 : vector<8x1xi1> to vector<8x128xi1>
    %14 = arith.select %13, %7, %6 : vector<8x128xi1>, vector<8x128xf32>
    %c0_10 = arith.constant 0 : index
    %c0_11 = arith.constant 0 : index
    %15 = vector.load %arg7[%c0_10, %c0_11] : memref<8x128xf32, #tpu.memory_space<vmem>>, vector<8x128xf32>
    tpu.vector_store %arg7[%c0_10, %c0_11], %14 {strides = array<i32>} : memref<8x128xf32, #tpu.memory_space<vmem>>, vector<8x128xf32>,
    return
  }
  func.func @transform_0(%arg0: i32, %arg1: i32) -> (i32, i32) {
    %c0_i32 = arith.constant 0 : i32
    %c0_i32_0 = arith.constant 0 : i32
    return %arg0, %c0_i32 : i32, i32
  }
  func.func @transform_1(%arg0: i32, %arg1: i32) -> (i32, i32) {
    %c0_i32 = arith.constant 0 : i32
    %c0_i32_0 = arith.constant 0 : i32
    return %arg0, %c0_i32 : i32, i32
  }
  func.func @transform_2(%arg0: i32, %arg1: i32) -> (i32, i32) {
    %c0_i32 = arith.constant 0 : i32
    return %arg0, %arg1 : i32, i32
  }
  func.func @transform_3(%arg0: i32, %arg1: i32) -> (i32, i32) {
    %c0_i32 = arith.constant 0 : i32
    return %arg0, %arg1 : i32, i32
  }
  func.func @transform_4(%arg0: i32, %arg1: i32) -> (i32, i32) {
    %c0_i32 = arith.constant 0 : i32
    return %arg0, %arg1 : i32, i32
  }
  func.func @transform_5(%arg0: i32, %arg1: i32) -> (i32, i32) {
    %c0_i32 = arith.constant 0 : i32
    return %arg0, %arg1 : i32, i32
  }
}

</mosaic_0001>

<bundles_post_ra>
// kernel: tpu_custom_call.1
= control target key start
LH: loop header
LB: loop body
LE: loop exit
PB: predicated region body
PF: predicated region fallthrough
CT: control target
= control target key end

     0   :  { %11 = vsyncpa [#allocation3], 0  ;;  %s1052_s0 = inlined_call_operand.vmem [shape: s32[8,1], index: 0, kind: input, shape index: {}]   ;;  %s1053_s1 = inlined_call_operand.vmem [shape: s32[8,1], index: 1, kind: input, shape index: {}]   ;;  %s1054_s2 = inlined_call_operand.vmem [shape: f32[8,256], index: 2, kind: input, shape index: {}]   ;;  %s1055_s3 = inlined_call_operand.hbm [shape: f32[8,256], index: 3, kind: input, shape index: {}]   ;;  %s1056_s4 = inlined_call_operand.hbm [shape: f32[8,256], index: 4, kind: output, shape index: {0}]   ;;  %s1057_s5 = inlined_call_operand.hbm [shape: f32[8,256], index: 5, kind: output, shape index: {1}]  }
   0x1   :  { %13 = vsyncpa [#allocation3 + $0x1], 0 }
   0x2   :  { %14 = vsyncpa [#allocation4], 0 }
   0x3   :  { %16 = vsyncpa [#allocation4 + $0x1], 0 }
   0x4   :  { %17 = vsyncpa [#allocation7], 0 }
   0x5   :  { %19 = vsyncpa [#allocation7 + $0x1], 0  ;;  %s824_s18 = smov 0   ;;  %s826_s19 = smov 0  }
   0x6   :  { %s828_s20 = smov 0   ;;  %s830_s21 = smov 0  }
   0x7   :  { %s832_s22 = smov 0   ;;  %s834_s23 = smov 0  }
   0x8 LB: > { %s556_s24 = sadd.s32 4294967295, %s788_s23   ;;  %s557_s25 = sadd.s32 4294967294, %s788_s23   ;;  %s788_s23 = sphi %s834_s23, %s25_s23   ;;  %s784_s22 = sphi %s832_s22, %s1075_s22   ;;  %s780_s21 = sphi %s830_s21, %s1074_s21   ;;  %s776_s20 = sphi %s828_s20, %s1073_s20   ;;  %s772_s19 = sphi %s826_s19, %s1072_s19   ;;  %s768_s18 = sphi %s824_s18, %s1071_s18  }
   0x9   : > { %s34_s26 = sadd.s32 1, %s784_s22  ;;  %s126_s27 = sadd.s32 1, %s776_s20 }
   0xa   : > { %p35_p0 = scmp.ge.s32.totalorder %s34_s26, 2  ;;  %p133_p1 = scmp.ne.s32.totalorder %s776_s20, %s772_s19 }
   0xb   : > { %p134_p2 = scmp.eq.s32.totalorder %s788_s23, 0  ;;  %p139_p3 = scmp.ne.s32.totalorder %s772_s19, %s768_s18 }
   0xc   : > { %s1077_s26 = smov (%p35_p0, %s34_s26), 0  ;;  %p140_p5 = scmp.eq.s32.totalorder %s556_s24, 0 }
   0xd   : > { %p865_p4 = por %p134_p2, %p133_p1  ;;  %s122_s29 = ssub.s32 %s784_s22, %s1077_s26 }
   0xe   : > { %p165_p6 = scmp.eq.s32.totalorder %s556_s24, 1  ;;  %p124_p7 = scmp.eq.s32.totalorder %s122_s29, 0 }
   0xf   : > { %p871_p8 = por %p140_p5, %p139_p3  ;;  %p171_p10 = scmp.eq.s32.totalorder %s557_s25, 1 }
  0x10   : > { %p875_p9 = por %p165_p6, %p133_p1  ;;  %p592_p13 = scmp.lt.s32.totalorder %s788_s23, 2 }
  0x11   : > { %s880_s7 = scalar_select %p124_p7, %s776_s20, %s126_s27  }
  0x12   : > { %s1062_s6 = scalar_select %p875_p9, 1, 0 }
  0x13   : > { %p882_p11 = por %p171_p10, %p139_p3  ;;  %s244_s9 = sand.u32 1, %s776_s20  }
  0x14   : > { %s562_s10 = sshll.u32 %s244_s9, 3  ;;  %s563_s11 = sshll.u32 %s784_s22, 7 }
  0x15   : > { %s1063_s8 = scalar_select %p882_p11, 1, 0 }
  0x16   : > { %s893_s14 = scalar_lea.hbm %s1055_s3, %s563_s11  ;;  %s248_s15 = scalar_lea.vmem [#allocation2], %s562_s10 }
  0x17   : > { %s257_s16 = sshll.u32 %s248_s15, 4  ;;  %p899_p0 = pnand %p592_p13, %p865_p4  ;;  %s895_s16 = int_to_ptr.vmem [resolvable:$true] %s257_s16 }
  0x18   : > { %s245_s24 = scalar_lea.sflag [#allocation3], %s244_s9  ;;  %s644_s25 = scalar_lea.hbm %s893_s14, 128 }
  0x19   : > { %p645_p3 = scmp.ne.s32.totalorder %s893_s14, %s644_s25  ;;  %p646_p5 = pneg %p899_p0 }
  0x1a   : > { %s649_s28 = scalar_lea.hbm %s1055_s3, 256  ;;  %p650_p4 = scmp.lt.u32.totalorder %s893_s14, %s1055_s3 }
  0x1b   : > { %p647_p6 = pnand %p646_p5, %p645_p3  ;;  %p651_p10 = scmp.lt.u32.totalorder %s649_s28, %s644_s25 }
  0x1c   : > { %p653_p12 = scmp.lt.u32.totalorder %s644_s25, %s893_s14 }
  0x1d   : > { %p648_p7 = pneg %p647_p6  ;;  %p652_p13 = por %p651_p10, %p650_p4 }
  0x1f   : > { %p654_p1 = por %p653_p12, %p652_p13 }
  0x21   : > { %p655_p2 = pnand %p654_p1, %p648_p7 }
  0x23   : > { %658 = shalt.err (!%p655_p2)
}
  0x24   : > { %s659_s9 = scalar_lea.vmem %s895_s16, 128  ;;  %s790_s12 = smov [#allocation2]  }
  0x25   : > { %p660_p3 = scmp.ne.s32.totalorder %s895_s16, %s659_s9  ;;  %s664_s13 = sshll.u32 %s790_s12, 4  ;;  %s665_s13 = int_to_ptr.vmem [resolvable:$false] %s664_s13 }
  0x26   : > { %s666_s15 = scalar_lea.vmem %s665_s13, 256  ;;  %p667_p9 = scmp.lt.s32.totalorder %s895_s16, %s665_s13 }
  0x27   : > { %p662_p6 = pnand %p660_p3, %p646_p5  ;;  %p668_p4 = scmp.lt.s32.totalorder %s666_s15, %s659_s9 }
  0x29   : > { %p663_p11 = pneg %p662_p6  ;;  %p669_p10 = por %p668_p4, %p667_p9 }
  0x2b   : > { %p670_p12 = pnand %p669_p10, %p663_p11 }
  0x2d   : > { %673 = shalt.err (!%p670_p12)
}
  0x2e   : > { %584 = dma.hbm_to_vmem [thread:$0]  (!%p899_p0), %s893_s14, 128, %s895_s16, %s245_s24  }
  0x2f   : > { %p1065_p1 = scmp.lt.s32.totalorder %s788_s23, 3  ;;  %p1066_p2 = scmp.ge.s32.totalorder %s788_s23, 1 }
  0x31   : > { %p263_p5 = pnand %p1066_p2, %p1065_p1 }
  0x32   : > { %s935_s25 = sand.u32 (!%p263_p5), 1, %s772_s19  }
  0x33   : > { %266 = sbr.rel (%p263_p5) target bundleno = 231 (0xe7), region = 36  ;;  %s938_s27 = sshll.u32 (!%p263_p5), %s935_s25, 3 }
  0x34   : > { %s269_s29 = scalar_lea.sflag (!%p263_p5), [#allocation3], %s935_s25  ;;  %s272_s17 = scalar_lea.vmem (!%p263_p5), [#allocation2], %s938_s27 }
  0x3a   : > { %755 = dma.done.wait (%p871_p8), %s269_s29, 128  }
  0x3b   : > { %757 = vsyncadd (%p871_p8), %s269_s29, 4294967168  ;;  %v791_v0 = vmov 0   ;;  %v336_v1 = vld [vmem:[%s1052_s0] sm:$0xff]  ;;  %p330_p8 = scmp.lt.s32.totalorder %s780_s21, 1  ;;  %s571_s13 = sshll.u32 %s780_s21, 7 }
  0x3c   : > { %643 = vset.pattern.permute.xlu0 %v791_v0  ;;  %v338_v2 = vld [vmem:[%s1053_s1] sm:$0xff]  ;;  %vm337_vm0 = vcmp.ne.s32.totalorder %v336_v1, 0  ;;  %s312_s15 = scalar_lea.vmem [#allocation5], %s938_s27  ;;  %s964_s24 = scalar_lea.hbm %s1056_s4, %s571_s13 }
  0x3d   : > { %vm339_vm1 = vcmp.ne.s32.totalorder %v338_v2, 0  ;;  %v342_v3 = vsel %vm337_vm0, 1, %v791_v0  ;;  %s331_s30 = scalar_select %p330_p8, %s780_s21, 1  ;;  %v341_v6 = vld [vmem:[%s272_s17] sm:$0xff] }
  0x3e   : > { %344 = vperm.xlu0 %643, %v342_v3   ;;  %v349_v4 = vsel %vm339_vm1, 1, %v791_v0  ;;  %s377_s29 = sshll.u32 %s312_s15, 4  ;;  %s1059_s28 = scalar_lea.vmem [#allocation6], %s938_s27  ;;  %s966_s29 = int_to_ptr.vmem [resolvable:$true] %s377_s29 }
  0x3f   : > { %s568_s10 = sshll.u32 %s331_s30, 3  ;;  %s971_s30 = sshll.u32 %s1059_s28, 4  ;;  %s1003_s30 = int_to_ptr.vmem [resolvable:$true] %s971_s30 }
  0x40   : > { %s335_s12 = scalar_lea.vmem %s1054_s2, %s568_s10  ;;  %s357_s17 = scalar_lea.sflag [#allocation4], %s935_s25 }
  0x41   : > { %v340_v5 = vld [vmem:[%s335_s12] sm:$0xff]  ;;  %s674_s10 = scalar_lea.vmem %s966_s29, 128  ;;  %p1067_p11 = scmp.ne.s32.totalorder %s1062_s6, 0 }
  0x42   : > { %351 = vperm.xlu0 %643, %v349_v4   ;;  %p675_p9 = scmp.ne.s32.totalorder %s966_s29, %s674_s10  ;;  %s792_s11 = smov [#allocation5]  }
  0x43   : > { %s678_s9 = sshll.u32 %s792_s11, 4  ;;  %s679_s9 = int_to_ptr.vmem [resolvable:$false] %s678_s9 }
  0x44   : > { %p676_p0 = pnand %p675_p9, %p1067_p11  ;;  %s680_s12 = scalar_lea.vmem %s679_s9, 256 }
  0x45   : > { %p681_p13 = scmp.lt.s32.totalorder %s966_s29, %s679_s9  ;;  %p682_p3 = scmp.lt.s32.totalorder %s680_s12, %s674_s10 }
  0x46   : > { %p677_p7 = pneg %p676_p0 }
  0x47   : > { %p683_p6 = por %p682_p3, %p681_p13 }
  0x49   : > { %p684_p4 = pnand %p683_p6, %p677_p7 }
  0xbd   : > { %v345_v7 = vpop.permute.xlu0 %344 }
  0xbe   : > { %vm346_vm2 = vcmp.eq.s32.totalorder %v345_v7, 1 }
  0xbf   : > { %v347_v8 = vsel %vm346_vm2, %v340_v5, %v341_v6 }
  0xc0   : > { %348 = vst [vmem:[%s312_s15] sm:$0xff] %v347_v8 }
  0xc1   : > { %v352_v9 = vpop.permute.xlu0 %351 }
  0xc2   : > { %687 = shalt.err (!%p684_p4)
}
  0xc3   : > { %s688_s15 = scalar_lea.hbm %s964_s24, 128  ;;  %s692_s11 = scalar_lea.hbm %s1056_s4, 256 }
  0xc4   : > { %p689_p10 = scmp.ne.s32.totalorder %s964_s24, %s688_s15  ;;  %p693_p2 = scmp.lt.u32.totalorder %s964_s24, %s1056_s4 }
  0xc5   : > { %p694_p5 = scmp.lt.u32.totalorder %s692_s11, %s688_s15  ;;  %p696_p9 = scmp.lt.u32.totalorder %s688_s15, %s964_s24 }
  0xc6   : > { %p690_p12 = pnand %p689_p10, %p1067_p11 }
  0xc7   : > { %p695_p8 = por %p694_p5, %p693_p2 }
  0xc8   : > { %p691_p1 = pneg %p690_p12 }
  0xc9   : > { %p697_p0 = por %p696_p9, %p695_p8 }
  0xcb   : > { %p698_p7 = pnand %p697_p0, %p691_p1 }
  0xcd   : > { %701 = shalt.err (!%p698_p7)
}
  0xce   : > { %577 = dma.vmem_to_hbm [thread:$0]  (%p1067_p11), %s966_s29, 128, %s964_s24, %s357_s17   ;;  %vm353_vm3 = vcmp.eq.s32.totalorder %v352_v9, 1 }
  0xcf   : > { %s1000_s12 = scalar_lea.hbm %s1057_s5, %s571_s13  ;;  %v354_v10 = vsel %vm353_vm3, %v341_v6, %v340_v5  ;;  %s1068_s15 = scalar_lea.vmem [#allocation6], %s938_s27 }
  0xd0   : > { %355 = vst [vmem:[%s1068_s15] sm:$0xff] %v354_v10  ;;  %s362_s14 = scalar_lea.sflag [#allocation7], %s935_s25  ;;  %s702_s16 = scalar_lea.vmem %s1003_s30, 128 }
  0xd1   : > { %p703_p13 = scmp.ne.s32.totalorder %s1003_s30, %s702_s16  ;;  %s793_s21 = smov [#allocation6]  }
  0xd2   : > { %s706_s29 = sshll.u32 %s793_s21, 4  ;;  %s707_s29 = int_to_ptr.vmem [resolvable:$false] %s706_s29 }
  0xd3   : > { %p704_p3 = pnand %p703_p13, %p1067_p11  ;;  %s708_s24 = scalar_lea.vmem %s707_s29, 256 }
  0xd4   : > { %p709_p4 = scmp.lt.s32.totalorder %s1003_s30, %s707_s29  ;;  %p710_p10 = scmp.lt.s32.totalorder %s708_s24, %s702_s16 }
  0xd5   : > { %p705_p6 = pneg %p704_p3 }
  0xd6   : > { %p711_p12 = por %p710_p10, %p709_p4 }
  0xd8   : > { %p712_p1 = pnand %p711_p12, %p705_p6 }
  0xda   : > { %715 = shalt.err (!%p712_p1)
}
  0xdb   : > { %s716_s25 = scalar_lea.hbm %s1000_s12, 128  ;;  %s720_s17 = scalar_lea.hbm %s1057_s5, 256 }
  0xdc   : > { %p717_p2 = scmp.ne.s32.totalorder %s1000_s12, %s716_s25  ;;  %p721_p9 = scmp.lt.u32.totalorder %s1000_s12, %s1057_s5 }
  0xdd   : > { %p722_p0 = scmp.lt.u32.totalorder %s720_s17, %s716_s25  ;;  %p724_p13 = scmp.lt.u32.totalorder %s716_s25, %s1000_s12 }
  0xde   : > { %p718_p5 = pnand %p717_p2, %p1067_p11 }
  0xdf   : > { %p723_p7 = por %p722_p0, %p721_p9 }
  0xe0   : > { %p719_p8 = pneg %p718_p5 }
  0xe1   : > { %p725_p3 = por %p724_p13, %p723_p7 }
  0xe3   : > { %p726_p6 = pnand %p725_p3, %p719_p8 }
  0xe5   : > { %729 = shalt.err (!%p726_p6)
}
  0xe6   : > { %578 = dma.vmem_to_hbm [thread:$0]  (%p1067_p11), %s1003_s30, 128, %s1000_s12, %s362_s14  }
  0xe7 PF: > { %s404_s28 = sand.u32 1, %s768_s18   ;;  %p1069_p4 = scmp.ne.s32.totalorder %s1063_s8, 0 }
  0xe8   : > { %p1070_p10 = scmp.ge.s32.totalorder %s788_s23, 2  ;;  %s405_s10 = scalar_lea.sflag [#allocation4], %s404_s28 }
  0xea   : > { %p586_p12 = pnand %p1070_p10, %p1069_p4 }
  0xec   : > { %759 = dma.done.wait (!%p586_p12), %s405_s10, 128  }
  0xed   : > { %761 = vsyncadd (!%p586_p12), %s405_s10, 4294967168  ;;  %s414_s15 = scalar_lea.sflag [#allocation7], %s404_s28 }
  0xee   : > { %763 = dma.done.wait (!%p586_p12), %s414_s15, 128  }
  0xef   : > { %765 = vsyncadd (!%p586_p12), %s414_s15, 4294967168  ;;  %s25_s23 = sadd.s32 1, %s788_s23   ;;  %s1071_s18 = smov %s772_s19 }
  0xf0   : > { %p22_p1 = scmp.ge.s32.totalorder %s25_s23, 4   ;;  %s1072_s19 = smov %s776_s20 }
  0xf1   : > { %s1073_s20 = smov %s880_s7  ;;  %s1074_s21 = smov %s784_s22 }
  0xf2   : > { %s1075_s22 = smov %s1077_s26  ;;  %24 = sbr.rel (!%p22_p1) target bundleno = 8 (0x8), region = 107 }
  0xf9   :  { %419 = vsyncpa [#allocation3], 1 }
  0xfa   :  { %421 = vsyncpa [#allocation3 + $0x1], 1 }
  0xfb   :  { %422 = vsyncpa [#allocation4], 1 }
  0xfc   :  { %424 = vsyncpa [#allocation4 + $0x1], 1 }
  0xfd   :  { %425 = vsyncpa [#allocation7], 1 }
  0xfe   :  { %427 = vsyncpa [#allocation7 + $0x1], 1 }

</bundles_post_ra>
